<compile_context>
chip_gen: v7x
topology: tpu7x:2x2x1
jax: 0.10.0
libtpu: 0.0.40
codegen_flags: <defaults>
</compile_context>

<pallas_src>
import functools

import jax
import jax.numpy as jnp
from jax.experimental import pallas as pl
from jax.experimental.pallas import tpu as pltpu

HIDDEN = 32          # logical hidden width of the PyTorch module
HP = 128             # lane-dense padded hidden width


def _round_up(x, m):
    return (x + m - 1) // m * m


def qnet_kernel(x_ref, w1_ref, b1_ref, w2_ref, b2_ref, w3_ref, b3_ref, o_ref,
                *, action_size):
    # Hoisted f32 bias reads (lane-dense (1, HP)).
    b1 = b1_ref[...]
    b2 = b2_ref[...]
    b3 = b3_ref[...]

    # fc1 + relu: bf16 MXU operands, f32 accumulation, f32 epilogue.
    x = x_ref[...].astype(jnp.bfloat16)
    h1 = jnp.dot(x, w1_ref[...], preferred_element_type=jnp.float32)
    h1 = jnp.maximum(h1 + b1, 0.0)

    # fc2 + relu
    h2 = jnp.dot(h1.astype(jnp.bfloat16), w2_ref[...],
                 preferred_element_type=jnp.float32)
    h2 = jnp.maximum(h2 + b2, 0.0)

    # fc3 (no activation). Transpose the (TB, HP) result on the XLU (idle
    # here) and store only the real action rows -> (A, TB) lane-dense block,
    # so output HBM traffic is A*TB*4 bytes instead of TB*128*4.
    o = jnp.dot(h2.astype(jnp.bfloat16), w3_ref[...],
                preferred_element_type=jnp.float32)
    o = (o + b3).T                                   # (HP, TB) f32
    o_ref[...] = o[:action_size, :].astype(o_ref.dtype)


@functools.partial(jax.jit, static_argnames=("action_size", "block_batch"))
def qnetwork_forward(x, params, *, action_size, block_batch=2048):
    """x: (B, state_size) f32. Returns (B, action_size) f32 Q-values."""
    w1, b1 = params["w1"], params["b1"]
    w2, b2 = params["w2"], params["b2"]
    w3, b3 = params["w3"], params["b3"]

    B, S = x.shape
    A = action_size
    assert block_batch % 128 == 0, "block_batch must be lane-aligned"

    # Batch tiling without wrapper-side pad/slice: cdiv grid + Pallas partial
    # trailing block (OOB reads padded, OOB writes dropped).
    if B <= 256:
        TB = B                                           # single full tile
    elif B <= block_batch:
        # >= 2 lane-aligned tiles so both v7x TensorCores get work.
        TB = min(block_batch, _round_up(pl.cdiv(B, 2), 128))
    else:
        TB = block_batch
    grid = (pl.cdiv(B, TB),)

    resident = lambda arr: pl.BlockSpec(arr.shape, lambda i: (0, 0))

    cost = pl.CostEstimate(
        flops=2 * B * HP * (S + HP + HP),
        transcendentals=0,
        bytes_accessed=(B * S * 4 + A * B * 4
                        + 2 * (w1.size + w2.size + w3.size)
                        + 4 * (b1.size + b2.size + b3.size)),
    )

    out_t = pl.pallas_call(
        functools.partial(qnet_kernel, action_size=A),
        out_shape=jax.ShapeDtypeStruct((A, B), jnp.float32),
        grid=grid,
        in_specs=[
            pl.BlockSpec((TB, S), lambda i: (i, 0)),   # streamed x batch tiles
            resident(w1), resident(b1),                # VMEM-resident params
            resident(w2), resident(b2),
            resident(w3), resident(b3),
        ],
        out_specs=pl.BlockSpec((A, TB), lambda i: (0, i)),
        compiler_params=pltpu.CompilerParams(
            dimension_semantics=("parallel",)),
        cost_estimate=cost,
    )(x, w1, b1, w2, b2, w3, b3)

    # (A, B) -> (B, A) to preserve the PyTorch module's output layout.
    return out_t.T


def init_params(key, state_size, action_size, hidden=HIDDEN):
    """PyTorch nn.Linear-style init (U(-1/sqrt(fan_in), 1/sqrt(fan_in))),
    then lane-dense zero-padding to 128 and bf16 cast for the MXU operands."""
    assert hidden <= HP and action_size <= HP and state_size <= HP

    def linear(k, fan_in, fan_out):
        kw, kb = jax.random.split(k)
        bound = 1.0 / jnp.sqrt(fan_in)
        w = jax.random.uniform(kw, (fan_out, fan_in), jnp.float32, -bound, bound)
        b = jax.random.uniform(kb, (fan_out,), jnp.float32, -bound, bound)
        return w.T, b.reshape(1, fan_out)              # (in, out), (1, out)

    k1, k2, k3 = jax.random.split(key, 3)
    w1, b1 = linear(k1, state_size, hidden)
    w2, b2 = linear(k2, hidden, hidden)
    w3, b3 = linear(k3, hidden, action_size)

    def pad2(a, rows, cols):
        return jnp.pad(a, ((0, rows - a.shape[0]), (0, cols - a.shape[1])))

    return {
        # padded bf16 MXU operands / padded f32 biases
        "w1": pad2(w1, state_size, HP).astype(jnp.bfloat16),
        "b1": pad2(b1, 1, HP),
        "w2": pad2(w2, HP, HP).astype(jnp.bfloat16),
        "b2": pad2(b2, 1, HP),
        "w3": pad2(w3, HP, HP).astype(jnp.bfloat16),
        "b3": pad2(b3, 1, HP),
        # unpadded f32 originals, kept only for the reference check
        "w1_f32": w1, "b1_f32": b1,
        "w2_f32": w2, "b2_f32": b2,
        "w3_f32": w3, "b3_f32": b3,
    }


def reference_forward(x, params, action_size):
    """Pure-JAX reference using the same bf16-rounded weights as the kernel
    (so the only residual difference is the bf16 activation cast)."""
    w1 = params["w1"].astype(jnp.float32)[:, :HIDDEN]
    w2 = params["w2"].astype(jnp.float32)[:HIDDEN, :HIDDEN]
    w3 = params["w3"].astype(jnp.float32)[:HIDDEN, :action_size]
    b1 = params["b1"][:, :HIDDEN]
    b2 = params["b2"][:, :HIDDEN]
    b3 = params["b3"][:, :action_size]
    h = jnp.maximum(x @ w1 + b1, 0.0)
    h = jnp.maximum(h @ w2 + b2, 0.0)
    return h @ w3 + b3


if __name__ == "__main__":
    key = jax.random.PRNGKey(0)
    k_params, k_x = jax.random.split(key)

    batch, state_size, action_size = 8, 8, 4
    params = init_params(k_params, state_size, action_size)
    x = jax.random.normal(k_x, (batch, state_size), jnp.float32)

    out = qnetwork_forward(x, params, action_size=action_size)
    out = jax.block_until_ready(out)

    ref = reference_forward(x, params, action_size)
    assert out.shape == (batch, action_size), out.shape
    # bf16 MXU operands -> loosened tolerance vs the f32 epilogue reference.
    assert jnp.allclose(out, ref, atol=5e-2, rtol=5e-2), (
        float(jnp.max(jnp.abs(out - ref))))
    print("KERNEL_OK")
</pallas_src>

<mosaic_0001>
module attributes {stable_mosaic.version = 11 : i64} {
  func.func @qnet_kernel(%arg0: i32, %arg1: memref<8x8xf32, #tpu.memory_space<vmem>>, %arg2: memref<8x128xbf16, #tpu.memory_space<vmem>>, %arg3: memref<1x128xf32, #tpu.memory_space<vmem>>, %arg4: memref<128x128xbf16, #tpu.memory_space<vmem>>, %arg5: memref<1x128xf32, #tpu.memory_space<vmem>>, %arg6: memref<128x128xbf16, #tpu.memory_space<vmem>>, %arg7: memref<1x128xf32, #tpu.memory_space<vmem>>, %arg8: memref<4x8xf32, #tpu.memory_space<vmem>>) attributes {dimension_semantics = [#tpu.dimension_semantics<parallel>], iteration_bounds = array<i64: 1>, scalar_prefetch = 0 : i64, scratch_operands = 0 : i64, tpu.core_type = #tpu.core_type<tc>, window_params = [{transform_indices = @transform_0, window_bounds = array<i64: 8, 8>}, {pipeline_mode = #tpu.pipeline_mode<synchronous>, transform_indices = @transform_1, window_bounds = array<i64: 8, 128>}, {pipeline_mode = #tpu.pipeline_mode<synchronous>, transform_indices = @transform_2, window_bounds = array<i64: 1, 128>}, {pipeline_mode = #tpu.pipeline_mode<synchronous>, transform_indices = @transform_3, window_bounds = array<i64: 128, 128>}, {pipeline_mode = #tpu.pipeline_mode<synchronous>, transform_indices = @transform_4, window_bounds = array<i64: 1, 128>}, {pipeline_mode = #tpu.pipeline_mode<synchronous>, transform_indices = @transform_5, window_bounds = array<i64: 128, 128>}, {pipeline_mode = #tpu.pipeline_mode<synchronous>, transform_indices = @transform_6, window_bounds = array<i64: 1, 128>}, {transform_indices = @transform_7, window_bounds = array<i64: 4, 8>}]} {
    %c0 = arith.constant 0 : index
    %c0_0 = arith.constant 0 : index
    %0 = vector.load %arg3[%c0, %c0_0] : memref<1x128xf32, #tpu.memory_space<vmem>>, vector<1x128xf32>
    %c0_1 = arith.constant 0 : index
    %c0_2 = arith.constant 0 : index
    %1 = vector.load %arg5[%c0_1, %c0_2] : memref<1x128xf32, #tpu.memory_space<vmem>>, vector<1x128xf32>
    %c0_3 = arith.constant 0 : index
    %c0_4 = arith.constant 0 : index
    %2 = vector.load %arg7[%c0_3, %c0_4] : memref<1x128xf32, #tpu.memory_space<vmem>>, vector<1x128xf32>
    %c0_5 = arith.constant 0 : index
    %c0_6 = arith.constant 0 : index
    %3 = vector.load %arg1[%c0_5, %c0_6] : memref<8x8xf32, #tpu.memory_space<vmem>>, vector<8x8xf32>
    %4 = arith.truncf %3 : vector<8x8xf32> to vector<8x8xbf16>
    %c0_7 = arith.constant 0 : index
    %c0_8 = arith.constant 0 : index
    %5 = vector.load %arg2[%c0_7, %c0_8] : memref<8x128xbf16, #tpu.memory_space<vmem>>, vector<8x128xbf16>
    %cst = arith.constant dense<0.000000e+00> : vector<8x128xf32>
    %6 = tpu.matmul %4, %5, %cst {dimension_numbers = #tpu.dot_dimension_numbers<[1], [0], [0], [1], [0, 0, 1, 1], [], []>} : vector<8x8xbf16>, vector<8x128xbf16>, vector<8x128xf32> -> vector<8x128xf32>
    %7 = vector.broadcast %0 : vector<1x128xf32> to vector<8x128xf32>
    %8 = arith.addf %6, %7 : vector<8x128xf32>
    %cst_9 = arith.constant 0.000000e+00 : f32
    %9 = vector.broadcast %cst_9 : f32 to vector<8x128xf32>
    %10 = arith.maximumf %8, %9 : vector<8x128xf32>
    %11 = arith.truncf %10 : vector<8x128xf32> to vector<8x128xbf16>
    %c0_10 = arith.constant 0 : index
    %c0_11 = arith.constant 0 : index
    %12 = vector.load %arg4[%c0_10, %c0_11] : memref<128x128xbf16, #tpu.memory_space<vmem>>, vector<128x128xbf16>
    %cst_12 = arith.constant dense<0.000000e+00> : vector<8x128xf32>
    %13 = tpu.matmul %11, %12, %cst_12 {dimension_numbers = #tpu.dot_dimension_numbers<[1], [0], [0], [1], [0, 0, 1, 1], [], []>} : vector<8x128xbf16>, vector<128x128xbf16>, vector<8x128xf32> -> vector<8x128xf32>
    %14 = vector.broadcast %1 : vector<1x128xf32> to vector<8x128xf32>
    %15 = arith.addf %13, %14 : vector<8x128xf32>
    %cst_13 = arith.constant 0.000000e+00 : f32
    %16 = vector.broadcast %cst_13 : f32 to vector<8x128xf32>
    %17 = arith.maximumf %15, %16 : vector<8x128xf32>
    %18 = arith.truncf %17 : vector<8x128xf32> to vector<8x128xbf16>
    %c0_14 = arith.constant 0 : index
    %c0_15 = arith.constant 0 : index
    %19 = vector.load %arg6[%c0_14, %c0_15] : memref<128x128xbf16, #tpu.memory_space<vmem>>, vector<128x128xbf16>
    %cst_16 = arith.constant dense<0.000000e+00> : vector<8x128xf32>
    %20 = tpu.matmul %18, %19, %cst_16 {dimension_numbers = #tpu.dot_dimension_numbers<[1], [0], [0], [1], [0, 0, 1, 1], [], []>} : vector<8x128xbf16>, vector<128x128xbf16>, vector<8x128xf32> -> vector<8x128xf32>
    %21 = vector.broadcast %2 : vector<1x128xf32> to vector<8x128xf32>
    %22 = arith.addf %20, %21 : vector<8x128xf32>
    %23 = tpu.transpose %22, [1, 0] : vector<8x128xf32> -> vector<128x8xf32>
    %24 = vector.extract_strided_slice %23 {offsets = [0, 0], sizes = [4, 8], strides = [1, 1]} : vector<128x8xf32> to vector<4x8xf32>
    %c0_17 = arith.constant 0 : index
    %c0_18 = arith.constant 0 : index
    %25 = vector.load %arg8[%c0_17, %c0_18] : memref<4x8xf32, #tpu.memory_space<vmem>>, vector<4x8xf32>
    tpu.vector_store %arg8[%c0_17, %c0_18], %24 {strides = array<i32>} : memref<4x8xf32, #tpu.memory_space<vmem>>, vector<4x8xf32>,
    return
  }
  func.func @transform_0(%arg0: i32) -> (i32, i32) {
    %c0_i32 = arith.constant 0 : i32
    %c0_i32_0 = arith.constant 0 : i32
    return %arg0, %c0_i32 : i32, i32
  }
  func.func @transform_1(%arg0: i32) -> (i32, i32) {
    %c0_i32 = arith.constant 0 : i32
    %c0_i32_0 = arith.constant 0 : i32
    %c0_i32_1 = arith.constant 0 : i32
    return %c0_i32, %c0_i32_0 : i32, i32
  }
  func.func @transform_2(%arg0: i32) -> (i32, i32) {
    %c0_i32 = arith.constant 0 : i32
    %c0_i32_0 = arith.constant 0 : i32
    %c0_i32_1 = arith.constant 0 : i32
    return %c0_i32, %c0_i32_0 : i32, i32
  }
  func.func @transform_3(%arg0: i32) -> (i32, i32) {
    %c0_i32 = arith.constant 0 : i32
    %c0_i32_0 = arith.constant 0 : i32
    %c0_i32_1 = arith.constant 0 : i32
    return %c0_i32, %c0_i32_0 : i32, i32
  }
  func.func @transform_4(%arg0: i32) -> (i32, i32) {
    %c0_i32 = arith.constant 0 : i32
    %c0_i32_0 = arith.constant 0 : i32
    %c0_i32_1 = arith.constant 0 : i32
    return %c0_i32, %c0_i32_0 : i32, i32
  }
  func.func @transform_5(%arg0: i32) -> (i32, i32) {
    %c0_i32 = arith.constant 0 : i32
    %c0_i32_0 = arith.constant 0 : i32
    %c0_i32_1 = arith.constant 0 : i32
    return %c0_i32, %c0_i32_0 : i32, i32
  }
  func.func @transform_6(%arg0: i32) -> (i32, i32) {
    %c0_i32 = arith.constant 0 : i32
    %c0_i32_0 = arith.constant 0 : i32
    %c0_i32_1 = arith.constant 0 : i32
    return %c0_i32, %c0_i32_0 : i32, i32
  }
  func.func @transform_7(%arg0: i32) -> (i32, i32) {
    %c0_i32 = arith.constant 0 : i32
    %c0_i32_0 = arith.constant 0 : i32
    return %c0_i32, %arg0 : i32, i32
  }
}

</mosaic_0001>

<bundles_post_ra>
// kernel: qnetwork_forward.1
= control target key start
LH: loop header
LB: loop body
LE: loop exit
PB: predicated region body
PF: predicated region fallthrough
CT: control target
= control target key end

     0   :  { %12 = vsyncpa [#allocation3], 0  ;;  %s742_s0 = inlined_call_operand.hbm [shape: f32[8,8], index: 0, kind: input, shape index: {}]   ;;  %s743_s1 = inlined_call_operand.vmem [shape: bf16[8,128], index: 1, kind: input, shape index: {}]   ;;  %s744_s2 = inlined_call_operand.vmem [shape: f32[1,128], index: 2, kind: input, shape index: {}]   ;;  %s745_s3 = inlined_call_operand.hbm [shape: bf16[128,128], index: 3, kind: input, shape index: {}]   ;;  %s746_s4 = inlined_call_operand.vmem [shape: f32[1,128], index: 4, kind: input, shape index: {}]   ;;  %s747_s5 = inlined_call_operand.hbm [shape: bf16[128,128], index: 5, kind: input, shape index: {}]   ;;  %s748_s6 = inlined_call_operand.vmem [shape: f32[1,128], index: 6, kind: input, shape index: {}]   ;;  %s749_s7 = inlined_call_operand.hbm [shape: f32[4,8], index: 7, kind: output, shape index: {}]  }
   0x1   :  { %13 = vsyncpa [#allocation6], 0 }
   0x2   :  { %14 = vsyncpa [#allocation4], 0  ;;  %s605_s24 = smov [#allocation5]   ;;  %s511_s28 = scalar_lea.hbm %s745_s3, 1024 }
   0x3   :  { %s34_s25 = sshll.u32 %s605_s24, 4  ;;  %p512_p0 = scmp.ne.s32.totalorder %s745_s3, %s511_s28  ;;  %s35_s25 = int_to_ptr.vmem [resolvable:$true] %s34_s25 }
   0x4   :  { %p515_p1 = scmp.lt.u32.totalorder %s511_s28, %s745_s3 }
   0x6   :  { %p517_p2 = pnand %p515_p1, %p512_p0 }
   0x8   :  { %520 = shalt.err (!%p517_p2)
}
   0x9   :  { %s521_s10 = scalar_lea.vmem %s35_s25, 1024  ;;  %p526_p4 = scmp.lt.s32.totalorder %s35_s25, %s35_s25 }
   0xa   :  { %p522_p3 = scmp.ne.s32.totalorder %s35_s25, %s521_s10  ;;  %p527_p5 = scmp.lt.s32.totalorder %s521_s10, %s521_s10 }
   0xc   :  { %p528_p6 = por %p527_p5, %p526_p4 }
   0xe   :  { %p529_p7 = pnand %p528_p6, %p522_p3 }
  0x10   :  { %532 = shalt.err (!%p529_p7)
}
  0x11   :  { %s606_s11 = smov 64   ;;  %s607_s12 = smov 4  }
  0x12   :  { %40 = dma.hbm_to_vmem [thread:$0]  %s745_s3, 1024, %s35_s25, [#allocation6], %s606_s11, %s606_s11, %s607_s12  }
  0x13   :  { %s608_s15 = smov [#allocation2]   ;;  %s609_s17 = smov [#allocation7]  }
  0x14   :  { %s21_s16 = sshll.u32 %s608_s15, 4  ;;  %s48_s18 = sshll.u32 %s609_s17, 4  ;;  %s22_s16 = int_to_ptr.vmem [resolvable:$true] %s21_s16  ;;  %s49_s18 = int_to_ptr.vmem [resolvable:$true] %s48_s18 }
  0x15   :  { %s533_s21 = scalar_lea.hbm %s742_s0, 128 }
  0x16   :  { %p534_p8 = scmp.ne.s32.totalorder %s742_s0, %s533_s21  ;;  %p537_p9 = scmp.lt.u32.totalorder %s533_s21, %s742_s0 }
  0x18   :  { %p539_p10 = pnand %p537_p9, %p534_p8 }
  0x1a   :  { %542 = shalt.err (!%p539_p10)
}
  0x1b   :  { %s543_s3 = scalar_lea.vmem %s22_s16, 128  ;;  %p548_p12 = scmp.lt.s32.totalorder %s22_s16, %s22_s16 }
  0x1c   :  { %p544_p11 = scmp.ne.s32.totalorder %s22_s16, %s543_s3  ;;  %p549_p13 = scmp.lt.s32.totalorder %s543_s3, %s543_s3 }
  0x1e   :  { %p550_p0 = por %p549_p13, %p548_p12 }
  0x20   :  { %p551_p1 = pnand %p550_p0, %p544_p11 }
  0x22   :  { %554 = shalt.err (!%p551_p1)
}
  0x23   :  { %24 = dma.hbm_to_vmem [thread:$0]  %s742_s0, 128, %s22_s16, [#allocation3]  }
  0x24   :  { %s555_s30 = scalar_lea.hbm %s747_s5, 1024 }
  0x25   :  { %p556_p2 = scmp.ne.s32.totalorder %s747_s5, %s555_s30  ;;  %p559_p3 = scmp.lt.u32.totalorder %s555_s30, %s747_s5 }
  0x27   :  { %p561_p4 = pnand %p559_p3, %p556_p2 }
  0x29   :  { %564 = shalt.err (!%p561_p4)
}
  0x2a   :  { %s565_s14 = scalar_lea.vmem %s49_s18, 1024  ;;  %p570_p6 = scmp.lt.s32.totalorder %s49_s18, %s49_s18 }
  0x2b   :  { %p566_p5 = scmp.ne.s32.totalorder %s49_s18, %s565_s14  ;;  %p571_p7 = scmp.lt.s32.totalorder %s565_s14, %s565_s14 }
  0x2d   :  { %p572_p8 = por %p571_p7, %p570_p6 }
  0x2f   :  { %p573_p9 = pnand %p572_p8, %p566_p5 }
  0x31   :  { %576 = shalt.err (!%p573_p9)
}
  0x32   :  { %54 = dma.hbm_to_vmem [thread:$0]  %s747_s5, 1024, %s49_s18, [#allocation6], %s606_s11, %s606_s11, %s607_s12  }
  0x33   :  { %599 = dma.done.wait [#allocation3], 128  }
  0x34   :  { %600 = vsyncadd [#allocation3], 4294967168 }
  0x35   :  { %601 = dma.done.wait [#allocation6], 2048  }
  0x36   :  { %602 = vsyncadd [#allocation6], 4294965248  ;;  %v610_v0 = vmov 0.0   ;;  %vm611_vm0 = vmmov 0   ;;  %vm83_vm1 = vcmask 1043456   ;;  %v70_v2 = vld [vmem:[#allocation2] sm:$0xff] }
  0x37   :  { %441 = vmatprep.subr.bf16.mxu0 %v610_v0  ;;  %443 = vmatprep.mubr.msk.bf16.mxu0 %vm611_vm0, %v610_v0  ;;  %v72_v1 = vld [vmem:[%s743_s1] sm:$0xf]  ;;  %v71_v4 = vpack.c.bf16 %v70_v2, %v70_v2  ;;  %v495_v5 = vld [vmem:[#allocation5] sm:$0xff]   ;;  %vm79_vm2 = vcmask 64512   ;;  %v496_v6 = vld [vmem:[#allocation5 + $0x8] sm:$0xff]   ;;  %s612_s19 = smov [#allocation8]  }
  0x38   :  { %447 = vmatprep.subr.bf16.mxu1 %v610_v0  ;;  %463 = vmatprep.mubr.msk.bf16.mxu1 %vm611_vm0, %v610_v0  ;;  %v85_v3 = vsel %vm83_vm1, %v72_v1, 0  ;;  %v497_v7 = vld [vmem:[#allocation5 + $0x10] sm:$0xff]   ;;  %v498_v8 = vld [vmem:[#allocation5 + $0x18] sm:$0xff]   ;;  %v499_v9 = vld [vmem:[#allocation5 + $0x20] sm:$0xff]   ;;  %vm383_vm3 = vcmask 60416  }
  0x39   :  { %442 = vmatpush3.bf16.msra.mxu0 %v85_v3  ;;  %448 = vmatpush3.bf16.msra.mxu1 %v495_v5  ;;  %v500_v10 = vld [vmem:[#allocation5 + $0x28] sm:$0xff]   ;;  %v501_v11 = vld [vmem:[#allocation5 + $0x30] sm:$0xff]   ;;  %v502_v12 = vld [vmem:[#allocation5 + $0x38] sm:$0xff]  }
  0x3a   :  { %467 = vmatprep.subr.bf16.mxu0 %v610_v0  ;;  %449 = vmatprep.subr.bf16.mxu1 %v610_v0  ;;  %v503_v13 = vld [vmem:[#allocation7] sm:$0xff]   ;;  %v504_v14 = vld [vmem:[#allocation7 + $0x8] sm:$0xff]   ;;  %v505_v15 = vld [vmem:[#allocation7 + $0x10] sm:$0xff]  }
  0x3b   :  { %v506_v16 = vld [vmem:[#allocation7 + $0x18] sm:$0xff]   ;;  %v507_v17 = vld [vmem:[#allocation7 + $0x20] sm:$0xff]   ;;  %v508_v18 = vld [vmem:[#allocation7 + $0x28] sm:$0xff]  }
  0x3c   :  { %444 = vmatmul.mubr.msk.bf16.vlgmr.msra.gmra.mrb[0].mxu0 %vm79_vm2, %v71_v4  ;;  %v401_v19 = vld [vmem:[%s744_s2] ss:$0 sm:$0xff]  ;;  %v509_v27 = vld [vmem:[#allocation7 + $0x30] sm:$0xff]  }
  0x3d   :  { %483 = vmatprep.mubr.msk.bf16.mxu0 %vm611_vm0, %v610_v0  ;;  %450 = vmatpush3.bf16.msra.mxu1 %v496_v6  ;;  %v510_v28 = vld [vmem:[#allocation7 + $0x38] sm:$0xff]  }
  0x3e   :  { %451 = vmatprep.subr.bf16.mxu1 %v610_v0  ;;  %468 = vmatpush3.bf16.msra.mxu0 %v503_v13  ;;  %v403_v29 = vld [vmem:[%s746_s4] ss:$0 sm:$0xff]  ;;  %s391_s4 = sshll.u32 %s612_s19, 4  ;;  %s392_s4 = int_to_ptr.vmem [resolvable:$true] %s391_s4 }
  0x3f   :  { %469 = vmatprep.subr.bf16.mxu0 %v610_v0  ;;  %v412_v37 = vld [vmem:[%s748_s6] ss:$0 sm:$0xff]  ;;  %s577_s20 = scalar_lea.vmem %s392_s4, 64  ;;  %p582_p11 = scmp.lt.s32.totalorder %s392_s4, %s392_s4 }
  0x40   :  { %p578_p10 = scmp.ne.s32.totalorder %s392_s4, %s577_s20  ;;  %p583_p12 = scmp.lt.s32.totalorder %s577_s20, %s577_s20 }
  0x41   :  { %452 = vmatpush3.bf16.msra.mxu1 %v497_v7 }
  0x42   :  { %453 = vmatprep.subr.bf16.mxu1 %v610_v0  ;;  %470 = vmatpush3.bf16.msra.mxu0 %v504_v14  ;;  %p584_p13 = por %p583_p12, %p582_p11 }
  0x43   :  { %471 = vmatprep.subr.bf16.mxu0 %v610_v0 }
  0x44   :  { %p585_p0 = pnand %p584_p13, %p578_p10 }
  0x45   :  { %454 = vmatpush3.bf16.msra.mxu1 %v498_v8 }
  0x46   :  { %455 = vmatprep.subr.bf16.mxu1 %v610_v0  ;;  %472 = vmatpush3.bf16.msra.mxu0 %v505_v15 }
  0x47   :  { %473 = vmatprep.subr.bf16.mxu0 %v610_v0 }
  0x49   :  { %456 = vmatpush3.bf16.msra.mxu1 %v499_v9 }
  0x4a   :  { %457 = vmatprep.subr.bf16.mxu1 %v610_v0  ;;  %474 = vmatpush3.bf16.msra.mxu0 %v506_v16 }
  0x4b   :  { %475 = vmatprep.subr.bf16.mxu0 %v610_v0 }
  0x4d   :  { %458 = vmatpush3.bf16.msra.mxu1 %v500_v10 }
  0x4e   :  { %459 = vmatprep.subr.bf16.mxu1 %v610_v0  ;;  %476 = vmatpush3.bf16.msra.mxu0 %v507_v17 }
  0x4f   :  { %477 = vmatprep.subr.bf16.mxu0 %v610_v0 }
  0x51   :  { %460 = vmatpush3.bf16.msra.mxu1 %v501_v11 }
  0x52   :  { %461 = vmatprep.subr.bf16.mxu1 %v610_v0  ;;  %478 = vmatpush3.bf16.msra.mxu0 %v508_v18 }
  0x53   :  { %479 = vmatprep.subr.bf16.mxu0 %v610_v0 }
  0x55   :  { %462 = vmatpush3.bf16.msra.mxu1 %v502_v12 }
  0x56   :  { %480 = vmatpush3.bf16.msra.mxu0 %v509_v27 }
  0x57   :  { %481 = vmatprep.subr.bf16.mxu0 %v610_v0 }
  0x5a   :  { %482 = vmatpush3.bf16.msra.mxu0 %v510_v28 }
 0x10f   :  { %v121_v20 = vpop.f32.mrb[0].mxu0 }
 0x110   :  { %v122_v21 = vadd.f32 %v401_v19, %v121_v20  ;;  %v445_v22 = vpop.f32.mrb[1].mxu0 }
 0x111   :  { %v124_v23 = vpop.f32.mrb[2].mxu0 }
 0x112   :  { %v127_v24 = vmax.f32 %v122_v21, 0.0  ;;  %v446_v25 = vpop.f32.mrb[3].mxu0 }
 0x114   :  { %v128_v26 = vpack.c.bf16 %v127_v24, %v127_v24 }
 0x116   :  { %464 = vmatmul.mubr.bf16.vlgmr.msra.gmra.mrb[0].mxu1 %v128_v26 }
 0x1e9   :  { %v233_v30 = vpop.f32.mrb[0].mxu1 }
 0x1ea   :  { %v234_v31 = vadd.f32 %v403_v29, %v233_v30  ;;  %v465_v32 = vpop.f32.mrb[1].mxu1 }
 0x1eb   :  { %v236_v33 = vpop.f32.mrb[2].mxu1 }
 0x1ec   :  { %v239_v34 = vmax.f32 %v234_v31, 0.0  ;;  %v466_v35 = vpop.f32.mrb[3].mxu1 }
 0x1ee   :  { %v240_v36 = vpack.c.bf16 %v239_v34, %v239_v34 }
 0x1f0   :  { %484 = vmatmul.mubr.bf16.vlgmr.msra.gmra.mrb[4].mxu0 %v240_v36 }
 0x2c3   :  { %v345_v38 = vpop.f32.mrb[4].mxu0 }
 0x2c4   :  { %v485_v39 = vpop.f32.mrb[5].mxu0  ;;  %v346_v40 = vadd.f32 %v412_v37, %v345_v38 }
 0x2c5   :  { %v348_v41 = vpop.f32.mrb[6].mxu0 }
 0x2c6   :  { %351 = vxpose.xlu0.b32.start.end [1/1] (short) (narrow) %v346_v40, 8  ;;  %v486_v42 = vpop.f32.mrb[7].mxu0 }
 0x346   :  { %v367_v43 = vpop.trf.xlu0 }
 0x347   :  { %384 = vst.msk [vmem:[#allocation8] sm:$0xf] %vm383_vm3, %v367_v43 }
 0x348   :  { %588 = shalt.err (!%p585_p0)
}
 0x349   :  { %s589_s22 = scalar_lea.hbm %s749_s7, 64 }
 0x34a   :  { %p590_p1 = scmp.ne.s32.totalorder %s749_s7, %s589_s22  ;;  %p593_p2 = scmp.lt.u32.totalorder %s589_s22, %s749_s7 }
 0x34c   :  { %p595_p3 = pnand %p593_p2, %p590_p1 }
 0x34e   :  { %598 = shalt.err (!%p595_p3)
}
 0x34f   :  { %394 = dma.vmem_to_hbm [thread:$0]  %s392_s4, 64, %s749_s7, [#allocation4]  }
 0x350   :  { %603 = dma.done.wait [#allocation4], 64  }
 0x351   :  { %604 = vsyncadd [#allocation4], 4294967232 }
 0x352   :  { %398 = vsyncpa [#allocation3], 1 }
 0x353   :  { %399 = vsyncpa [#allocation6], 1 }
 0x354   :  { %400 = vsyncpa [#allocation4], 1 }

</bundles_post_ra>
